<compile_context>
chip_gen: v6e
topology: v6e:2x2x1
jax: 0.10.0
libtpu: 0.0.40
codegen_flags: <defaults>
</compile_context>

<pallas_src>
import jax
import jax.numpy as jnp
from jax.experimental import pallas as pl
from jax.experimental.pallas import tpu as pltpu


def _round_up(x, m):
    return ((x + m - 1) // m) * m


def _linear_kernel(x_ref, w_ref, b_ref, o_ref):
    # x_ref: (TB, k*F) folded batch tile (lane-dense)
    # w_ref: (k*F, k)  block-diagonal weight (resident across the grid)
    # b_ref: (1,)      f32 bias scalar in SMEM
    # o_ref: (TB, k)   folded output tile
    y = jnp.dot(
        x_ref[...],
        w_ref[...],
        preferred_element_type=jnp.float32,
        precision=jax.lax.Precision.HIGHEST,
    )
    o_ref[...] = (y + b_ref[0]).astype(o_ref.dtype)


def linear_net_forward(x, weight, bias, *,
                       target_tile_bytes=4 * 1024 * 1024,
                       min_grid_steps=4):
    """Forward pass of LinearNet: y = x @ W^T + b.

    x:      (B, F)
    weight: (1, F)  (PyTorch nn.Linear layout)
    bias:   (1,)
    returns (B, 1) in x.dtype
    """
    B, F = x.shape
    out_dtype = x.dtype

    # Lane-fold factor: pack k consecutive rows into one 128-lane-dense row.
    k = 128 // F if (F < 128 and 128 % F == 0) else 1
    Fk = k * F

    # Pad batch only to a multiple of 8*k (sublane alignment of the folded
    # view).  This is at most 8*k-1 rows -- NOT a pad to a tile multiple.
    Bp = _round_up(B, 8 * k)
    if Bp != B:
        x = jnp.pad(x, ((0, Bp - B), (0, 0)))
    Bf = Bp // k
    x_f = x.reshape(Bf, Fk)  # row-major reshape: layout-preserving

    # Bytes-based batch tile: ~target_tile_bytes of folded x per grid step.
    row_bytes = Fk * jnp.dtype(x.dtype).itemsize
    tb = max(8, (target_tile_bytes // row_bytes) // 8 * 8)
    # Keep at least `min_grid_steps` steps so the parallel axis can shard
    # across both TensorCores on v7x (harmless on v5e/v6e).
    tb = min(tb, max(8, _round_up(pl.cdiv(Bf, min_grid_steps), 8)))
    tb = min(tb, Bf)  # Bf is a multiple of 8, so tb stays 8-aligned
    grid = pl.cdiv(Bf, tb)  # partial last block is masked by Pallas

    # Block-diagonal replication of the weight row: w_bd[j*F + f, j] = w[f].
    w_vec = weight.reshape(F).astype(x.dtype)
    w_bd = (jnp.eye(k, dtype=x.dtype)[:, None, :]
            * w_vec[None, :, None]).reshape(Fk, k)
    b_sc = bias.reshape(1).astype(jnp.float32)

    out = pl.pallas_call(
        _linear_kernel,
        out_shape=jax.ShapeDtypeStruct((Bf, k), out_dtype),
        grid_spec=pl.GridSpec(
            grid=(grid,),
            in_specs=[
                pl.BlockSpec((tb, Fk), lambda i: (i, 0)),            # x tile
                pl.BlockSpec((Fk, k), lambda i: (0, 0)),             # weight
                pl.BlockSpec(memory_space=pltpu.MemorySpace.SMEM),   # bias
            ],
            out_specs=pl.BlockSpec((tb, k), lambda i: (i, 0)),
        ),
        compiler_params=pltpu.CompilerParams(
            dimension_semantics=("parallel",),
            vmem_limit_bytes=32 * 1024 * 1024,
        ),
    )(x_f, w_bd, b_sc)

    # TODO(synk): if F ever grows so large that a (tb, k*F) tile exceeds the
    # VMEM budget, add an "arbitrary" grid axis over F with an f32 accumulator
    # scratch instead of shrinking the batch tile.
    return out.reshape(Bp, 1)[:B]


if __name__ == "__main__":
    n_feature = 32
    batch = 8

    key = jax.random.PRNGKey(0)
    kx, kw, kb = jax.random.split(key, 3)

    # Deterministic params mimicking nn.Linear default init (uniform +-1/sqrt(F)).
    bound = 1.0 / (n_feature ** 0.5)
    weight = jax.random.uniform(kw, (1, n_feature), jnp.float32, -bound, bound)
    bias = jax.random.uniform(kb, (1,), jnp.float32, -bound, bound)
    x = jax.random.normal(kx, (batch, n_feature), jnp.float32)

    y = linear_net_forward(x, weight, bias)
    y = jax.block_until_ready(y)

    # Reference check against plain JAX.
    y_ref = x @ weight.T + bias
    assert y.shape == (batch, 1)
    assert jnp.allclose(y, y_ref, atol=1e-4, rtol=1e-4)

    print("KERNEL_OK")
</pallas_src>

<mosaic_0001>
module attributes {stable_mosaic.version = 11 : i64} {
  func.func @_linear_kernel(%arg0: i32, %arg1: memref<8x128xf32, #tpu.memory_space<vmem>>, %arg2: memref<128x4xf32, #tpu.memory_space<vmem>>, %arg3: memref<1xf32, #tpu.memory_space<smem>>, %arg4: memref<8x4xf32, #tpu.memory_space<vmem>>) attributes {dimension_semantics = [#tpu.dimension_semantics<parallel>], iteration_bounds = array<i64: 1>, scalar_prefetch = 0 : i64, scratch_operands = 0 : i64, tpu.core_type = #tpu.core_type<tc>, window_params = [{transform_indices = @transform_0, window_bounds = array<i64: 8, 128>}, {pipeline_mode = #tpu.pipeline_mode<synchronous>, transform_indices = @transform_1, window_bounds = array<i64: 128, 4>}, {transform_indices = @transform_2, window_bounds = array<i64: 1>}, {transform_indices = @transform_3, window_bounds = array<i64: 8, 4>}]} {
    %c0 = arith.constant 0 : index
    %c0_0 = arith.constant 0 : index
    %0 = vector.load %arg1[%c0, %c0_0] : memref<8x128xf32, #tpu.memory_space<vmem>>, vector<8x128xf32>
    %c0_1 = arith.constant 0 : index
    %c0_2 = arith.constant 0 : index
    %1 = vector.load %arg2[%c0_1, %c0_2] : memref<128x4xf32, #tpu.memory_space<vmem>>, vector<128x4xf32>
    %cst = arith.constant dense<0.000000e+00> : vector<8x4xf32>
    %2 = tpu.matmul %0, %1, %cst {dimension_numbers = #tpu.dot_dimension_numbers<[1], [0], [0], [1], [0, 0, 1, 1], [], []>, precision = #tpu.contract_precision<fp32>} : vector<8x128xf32>, vector<128x4xf32>, vector<8x4xf32> -> vector<8x4xf32>
    %c0_3 = arith.constant 0 : index
    %3 = memref.load %arg3[%c0_3] : memref<1xf32, #tpu.memory_space<smem>>
    %4 = vector.broadcast %3 : f32 to vector<8x4xf32>
    %5 = arith.addf %2, %4 : vector<8x4xf32>
    %c0_4 = arith.constant 0 : index
    %c0_5 = arith.constant 0 : index
    %6 = vector.load %arg4[%c0_4, %c0_5] : memref<8x4xf32, #tpu.memory_space<vmem>>, vector<8x4xf32>
    tpu.vector_store %arg4[%c0_4, %c0_5], %5 {strides = array<i32>} : memref<8x4xf32, #tpu.memory_space<vmem>>, vector<8x4xf32>,
    return
  }
  func.func @transform_0(%arg0: i32) -> (i32, i32) {
    %c0_i32 = arith.constant 0 : i32
    %c0_i32_0 = arith.constant 0 : i32
    return %arg0, %c0_i32 : i32, i32
  }
  func.func @transform_1(%arg0: i32) -> (i32, i32) {
    %c0_i32 = arith.constant 0 : i32
    %c0_i32_0 = arith.constant 0 : i32
    %c0_i32_1 = arith.constant 0 : i32
    return %c0_i32, %c0_i32_0 : i32, i32
  }
  func.func @transform_2(%arg0: i32) -> i32 {
    %c0_i32 = arith.constant 0 : i32
    %c0_i32_0 = arith.constant 0 : i32
    return %c0_i32 : i32
  }
  func.func @transform_3(%arg0: i32) -> (i32, i32) {
    %c0_i32 = arith.constant 0 : i32
    %c0_i32_0 = arith.constant 0 : i32
    return %arg0, %c0_i32 : i32, i32
  }
}

</mosaic_0001>

<bundles_post_ra>
// kernel: tpu_custom_call.1
= control target key start
LH: loop header
LB: loop body
LE: loop exit
PB: predicated region body
PF: predicated region fallthrough
CT: control target
= control target key end

     0   :  { %v995_v0 = vmov 0.0   ;;  %vm996_vm0 = vmmov 0   ;;  %vm675_vm1 = vcmask 31744   ;;  %s1437_s1 = inlined_call_operand.vmem [shape: f32[128,4], index: 1, kind: input, shape index: {}]   ;;  %s1438_s0 = inlined_call_operand.vmem [shape: f32[8,128], index: 0, kind: input, shape index: {}]   ;;  %s1439_s2 = inlined_call_operand.<no memory space> [shape: f32[1], index: 2, kind: input, shape index: {}]   ;;  %s1440_s3 = inlined_call_operand.vmem [shape: f32[8,4], index: 3, kind: output, shape index: {}]  }
   0x1   :  { %783 = vmatprep.subr.mxu0 %v995_v0  ;;  %v31_v1 = vld [vmem:[%s1437_s1 + $0x78] sm:$0xff]  ;;  %v30_v2 = vld [vmem:[%s1437_s1 + $0x70] sm:$0xff]  ;;  %v29_v3 = vld [vmem:[%s1437_s1 + $0x68] sm:$0xff]  ;;  %818 = vmatprep.subr.mxu1 %v995_v0 }
   0x2   :  { %v1028_v4 = vand.u32 4294901760, %v31_v1  ;;  %v1030_v5 = vand.u32 4294901760, %v30_v2  ;;  %v1032_v6 = vand.u32 4294901760, %v29_v3  ;;  %v28_v7 = vld [vmem:[%s1437_s1 + $0x60] sm:$0xff]  ;;  %v27_v8 = vld [vmem:[%s1437_s1 + $0x58] sm:$0xff]  ;;  %v26_v9 = vld [vmem:[%s1437_s1 + $0x50] sm:$0xff]  ;;  %815 = vmatprep.mubr.msk.f32.mxu0 %vm996_vm0, %v995_v0  ;;  %850 = vmatprep.mubr.msk.f32.mxu1 %vm996_vm0, %v995_v0 }
   0x3   :  { %v1047_v10 = vand.u32 4294901760, %v28_v7  ;;  %v1049_v11 = vand.u32 4294901760, %v27_v8  ;;  %v1051_v12 = vand.u32 4294901760, %v26_v9  ;;  %v25_v13 = vld [vmem:[%s1437_s1 + $0x48] sm:$0xff]  ;;  %v24_v14 = vld [vmem:[%s1437_s1 + $0x40] sm:$0xff]  ;;  %v23_v19 = vld [vmem:[%s1437_s1 + $0x38] sm:$0xff] }
   0x4   :  { %784 = vmatpush3.msra.mxu0 %v1028_v4  ;;  %v1061_v15 = vsub.f32 %v31_v1, %v1028_v4  ;;  %v1064_v16 = vsub.f32 %v30_v2, %v1030_v5  ;;  %v1066_v17 = vand.u32 4294901760, %v25_v13  ;;  %v1069_v18 = vsub.f32 %v29_v3, %v1032_v6  ;;  %v22_v26 = vld [vmem:[%s1437_s1 + $0x30] sm:$0xff]  ;;  %v21_v36 = vld [vmem:[%s1437_s1 + $0x28] sm:$0xff]  ;;  %v20_v41 = vld [vmem:[%s1437_s1 + $0x20] sm:$0xff] }
   0x5   :  { %785 = vmatprep.subr.mxu0 %v995_v0  ;;  %v1076_v20 = vsub.f32 %v28_v7, %v1047_v10  ;;  %v1079_v21 = vsub.f32 %v27_v8, %v1049_v11  ;;  %v1085_v25 = vand.u32 4294901760, %v24_v14  ;;  %v1092_v28 = vand.u32 4294901760, %v23_v19  ;;  %v19_v49 = vld [vmem:[%s1437_s1 + $0x18] sm:$0xff]  ;;  %v15_v50 = vld [vmem:[%s1438_s0] sm:$0xff]  ;;  %v18_v54 = vld [vmem:[%s1437_s1 + $0x10] sm:$0xff] }
   0x6   :  { %786 = vmatpush3.msra.mxu0 %v1030_v5  ;;  %v128_v22 = vand.u32 4294901760, %v1061_v15  ;;  %v135_v23 = vand.u32 4294901760, %v1064_v16  ;;  %v142_v24 = vand.u32 4294901760, %v1069_v18  ;;  %v1096_v30 = vsub.f32 %v26_v9, %v1051_v12  ;;  %v17_v60 = vld [vmem:[%s1437_s1 + $0x8] sm:$0xff]  ;;  %v16_v7 = vld [vmem:[%s1437_s1] sm:$0xff] }
   0x7   :  { %787 = vmatprep.subr.mxu0 %v995_v0  ;;  %v149_v27 = vand.u32 4294901760, %v1076_v20  ;;  %v156_v29 = vand.u32 4294901760, %v1079_v21  ;;  %v1109_v34 = vsub.f32 %v25_v13, %v1066_v17  ;;  %v1112_v35 = vand.u32 4294901760, %v22_v26 }
   0x8   :  { %788 = vmatpush3.msra.mxu0 %v1032_v6  ;;  %v129_v31 = vsub.f32 %v1061_v15, %v128_v22  ;;  %v136_v32 = vsub.f32 %v1064_v16, %v135_v23  ;;  %v143_v33 = vsub.f32 %v1069_v18, %v142_v24  ;;  %v163_v40 = vand.u32 4294901760, %v1096_v30 }
   0x9   :  { %789 = vmatprep.subr.mxu0 %v995_v0  ;;  %v150_v39 = vsub.f32 %v1076_v20, %v149_v27  ;;  %v157_v42 = vsub.f32 %v1079_v21, %v156_v29  ;;  %v1130_v43 = vsub.f32 %v24_v14, %v1085_v25  ;;  %v1133_v45 = vand.u32 4294901760, %v21_v36 }
   0xa   :  { %790 = vmatpush3.msra.mxu0 %v1047_v10  ;;  %v130_v37 = vand.u32 4294901760, %v129_v31  ;;  %v137_v38 = vand.u32 4294901760, %v136_v32  ;;  %v144_v44 = vand.u32 4294901760, %v143_v33  ;;  %v170_v46 = vand.u32 4294901760, %v1109_v34 }
   0xb   :  { %791 = vmatprep.subr.mxu0 %v995_v0  ;;  %v1137_v47 = vsub.f32 %v23_v19, %v1092_v28  ;;  %v1141_v48 = vand.u32 4294901760, %v20_v41  ;;  %v151_v51 = vand.u32 4294901760, %v150_v39  ;;  %v164_v52 = vsub.f32 %v1096_v30, %v163_v40 }
   0xc   :  { %792 = vmatpush3.msra.mxu0 %v1049_v11  ;;  %819 = vmatpush3.msra.mxu1 %v130_v37  ;;  %v177_v53 = vand.u32 4294901760, %v1130_v43  ;;  %v1158_v55 = vsub.f32 %v22_v26, %v1112_v35  ;;  %v158_v56 = vand.u32 4294901760, %v157_v42  ;;  %v171_v58 = vsub.f32 %v1109_v34, %v170_v46 }
   0xd   :  { %793 = vmatprep.subr.mxu0 %v995_v0  ;;  %820 = vmatprep.subr.mxu1 %v995_v0  ;;  %v184_v57 = vand.u32 4294901760, %v1137_v47  ;;  %v1167_v59 = vand.u32 4294901760, %v19_v49  ;;  %v1173_v61 = vsub.f32 %v21_v36, %v1133_v45  ;;  %v1175_v62 = vand.u32 4294901760, %v15_v50 }
   0xe   :  { %794 = vmatpush3.msra.mxu0 %v1051_v12  ;;  %821 = vmatpush3.msra.mxu1 %v137_v38  ;;  %v1179_v63 = vand.u32 4294901760, %v18_v54  ;;  %v165_v1 = vand.u32 4294901760, %v164_v52  ;;  %v178_v2 = vsub.f32 %v1130_v43, %v177_v53  ;;  %v191_v3 = vand.u32 4294901760, %v1158_v55 }
   0xf   :  { %795 = vmatprep.subr.mxu0 %v995_v0  ;;  %822 = vmatprep.subr.mxu1 %v995_v0  ;;  %v1190_v8 = vsub.f32 %v20_v41, %v1141_v48  ;;  %v185_v9 = vsub.f32 %v1137_v47, %v184_v57  ;;  %v1197_v13 = vand.u32 4294901760, %v17_v60  ;;  %v172_v14 = vand.u32 4294901760, %v171_v58 }
  0x10   :  { %796 = vmatpush3.msra.mxu0 %v1066_v17  ;;  %823 = vmatpush3.msra.mxu1 %v144_v44  ;;  %v198_v19 = vand.u32 4294901760, %v1173_v61  ;;  %v1202_v26 = vsub.f32 %v15_v50, %v1175_v62  ;;  %v1205_v31 = vsub.f32 %v19_v49, %v1167_v59  ;;  %v1209_v32 = vand.u32 4294901760, %v16_v7 }
  0x11   :  { %797 = vmatprep.subr.mxu0 %v995_v0  ;;  %824 = vmatprep.subr.mxu1 %v995_v0  ;;  %v179_v33 = vand.u32 4294901760, %v178_v2  ;;  %v192_v36 = vsub.f32 %v1158_v55, %v191_v3  ;;  %v205_v37 = vand.u32 4294901760, %v1190_v8  ;;  %v1217_v38 = vsub.f32 %v18_v54, %v1179_v63 }
  0x12   :  { %798 = vmatpush3.msra.mxu0 %v1085_v25  ;;  %825 = vmatpush3.msra.mxu1 %v151_v51  ;;  %v186_v39 = vand.u32 4294901760, %v185_v9  ;;  %v199_v41 = vsub.f32 %v1173_v61, %v198_v19  ;;  %v117_v42 = vand.u32 4294901760, %v1202_v26  ;;  %v212_v44 = vand.u32 4294901760, %v1205_v31 }
  0x13   :  { %799 = vmatprep.subr.mxu0 %v995_v0  ;;  %826 = vmatprep.subr.mxu1 %v995_v0  ;;  %v1228_v49 = vsub.f32 %v17_v60, %v1197_v13  ;;  %v193_v50 = vand.u32 4294901760, %v192_v36  ;;  %v206_v51 = vsub.f32 %v1190_v8, %v205_v37  ;;  %v219_v52 = vand.u32 4294901760, %v1217_v38 }
  0x14   :  { %800 = vmatpush3.msra.mxu0 %v1092_v28  ;;  %827 = vmatpush3.msra.mxu1 %v158_v56  ;;  %v1238_v54 = vsub.f32 %v16_v7, %v1209_v32  ;;  %v200_v56 = vand.u32 4294901760, %v199_v41  ;;  %v118_v58 = vsub.f32 %v1202_v26, %v117_v42  ;;  %v213_v60 = vsub.f32 %v1205_v31, %v212_v44 }
  0x15   :  { %801 = vmatprep.subr.mxu0 %v995_v0  ;;  %828 = vmatprep.subr.mxu1 %v995_v0  ;;  %v207_v2 = vand.u32 4294901760, %v206_v51  ;;  %v220_v7 = vsub.f32 %v1217_v38, %v219_v52 }
  0x16   :  { %802 = vmatpush3.msra.mxu0 %v1112_v35  ;;  %829 = vmatpush3.msra.mxu1 %v165_v1  ;;  %v226_v1 = vand.u32 4294901760, %v1228_v49  ;;  %v233_v9 = vand.u32 4294901760, %v1238_v54 }
  0x17   :  { %803 = vmatprep.subr.mxu0 %v995_v0  ;;  %830 = vmatprep.subr.mxu1 %v995_v0 }
  0x18   :  { %804 = vmatpush3.msra.mxu0 %v1133_v45  ;;  %831 = vmatpush3.msra.mxu1 %v172_v14  ;;  %v119_v14 = vand.u32 4294901760, %v118_v58  ;;  %v227_v36 = vsub.f32 %v1228_v49, %v226_v1  ;;  %v234_v41 = vsub.f32 %v1238_v54, %v233_v9 }
  0x19   :  { %805 = vmatprep.subr.mxu0 %v995_v0  ;;  %832 = vmatprep.subr.mxu1 %v995_v0 }
  0x1a   :  { %806 = vmatpush3.msra.mxu0 %v1141_v48  ;;  %833 = vmatpush3.msra.mxu1 %v179_v33  ;;  %v214_v33 = vand.u32 4294901760, %v213_v60  ;;  %v235_v51 = vand.u32 4294901760, %v234_v41 }
  0x1b   :  { %807 = vmatprep.subr.mxu0 %v995_v0  ;;  %834 = vmatprep.subr.mxu1 %v995_v0 }
  0x1c   :  { %808 = vmatpush3.msra.mxu0 %v1167_v59  ;;  %835 = vmatpush3.msra.mxu1 %v186_v39  ;;  %v221_v39 = vand.u32 4294901760, %v220_v7 }
  0x1d   :  { %809 = vmatprep.subr.mxu0 %v995_v0  ;;  %836 = vmatprep.subr.mxu1 %v995_v0 }
  0x1e   :  { %810 = vmatpush3.msra.mxu0 %v1179_v63  ;;  %837 = vmatpush3.msra.mxu1 %v193_v50  ;;  %v228_v50 = vand.u32 4294901760, %v227_v36 }
  0x1f   :  { %811 = vmatprep.subr.mxu0 %v995_v0  ;;  %838 = vmatprep.subr.mxu1 %v995_v0 }
  0x20   :  { %812 = vmatpush3.msra.mxu0 %v1197_v13  ;;  %839 = vmatpush3.msra.mxu1 %v200_v56 }
  0x21   :  { %813 = vmatprep.subr.mxu0 %v995_v0  ;;  %840 = vmatprep.subr.mxu1 %v995_v0 }
  0x22   :  { %814 = vmatpush3.msra.mxu0 %v1209_v32  ;;  %841 = vmatpush3.msra.mxu1 %v207_v2 }
  0x23   :  { %842 = vmatprep.subr.mxu1 %v995_v0  ;;  %853 = vmatprep.subr.mxu0 %v995_v0 }
  0x24   :  { %816 = vmatmul.mubr.f32.vlgmr.msra.gmra.mxu0 %v119_v14  ;;  %843 = vmatpush3.msra.mxu1 %v214_v33 }
  0x25   :  { %854 = vmatpush3.msra.mxu0 %v1061_v15  ;;  %844 = vmatprep.subr.mxu1 %v995_v0 }
  0x26   :  { %855 = vmatprep.subr.mxu0 %v995_v0  ;;  %845 = vmatpush3.msra.mxu1 %v221_v39 }
  0x27   :  { %856 = vmatpush3.msra.mxu0 %v1064_v16  ;;  %846 = vmatprep.subr.mxu1 %v995_v0 }
  0x28   :  { %857 = vmatprep.subr.mxu0 %v995_v0  ;;  %847 = vmatpush3.msra.mxu1 %v228_v50 }
  0x29   :  { %858 = vmatpush3.msra.mxu0 %v1069_v18  ;;  %848 = vmatprep.subr.mxu1 %v995_v0 }
  0x2a   :  { %859 = vmatprep.subr.mxu0 %v995_v0  ;;  %849 = vmatpush3.msra.mxu1 %v235_v51 }
  0x2b   :  { %860 = vmatpush3.msra.mxu0 %v1076_v20  ;;  %851 = vmatmul.mubr.f32.vlgmr.msra.gmra.mxu1 %v1175_v62 }
  0x2c   :  { %861 = vmatprep.subr.mxu0 %v995_v0  ;;  %888 = vmatprep.subr.mxu1 %v995_v0 }
  0x2d   :  { %862 = vmatpush3.msra.mxu0 %v1079_v21  ;;  %889 = vmatpush3.msra.mxu1 %v1028_v4 }
  0x2e   :  { %863 = vmatprep.subr.mxu0 %v995_v0  ;;  %890 = vmatprep.subr.mxu1 %v995_v0 }
  0x2f   :  { %864 = vmatpush3.msra.mxu0 %v1096_v30  ;;  %891 = vmatpush3.msra.mxu1 %v1030_v5 }
  0x30   :  { %865 = vmatprep.subr.mxu0 %v995_v0  ;;  %892 = vmatprep.subr.mxu1 %v995_v0 }
  0x31   :  { %866 = vmatpush3.msra.mxu0 %v1109_v34  ;;  %893 = vmatpush3.msra.mxu1 %v1032_v6 }
  0x32   :  { %867 = vmatprep.subr.mxu0 %v995_v0  ;;  %894 = vmatprep.subr.mxu1 %v995_v0 }
  0x33   :  { %868 = vmatpush3.msra.mxu0 %v1130_v43  ;;  %895 = vmatpush3.msra.mxu1 %v1047_v10 }
  0x34   :  { %869 = vmatprep.subr.mxu0 %v995_v0  ;;  %896 = vmatprep.subr.mxu1 %v995_v0 }
  0x35   :  { %870 = vmatpush3.msra.mxu0 %v1137_v47  ;;  %897 = vmatpush3.msra.mxu1 %v1049_v11 }
  0x36   :  { %871 = vmatprep.subr.mxu0 %v995_v0  ;;  %898 = vmatprep.subr.mxu1 %v995_v0 }
  0x37   :  { %872 = vmatpush3.msra.mxu0 %v1158_v55  ;;  %899 = vmatpush3.msra.mxu1 %v1051_v12 }
  0x38   :  { %873 = vmatprep.subr.mxu0 %v995_v0  ;;  %900 = vmatprep.subr.mxu1 %v995_v0 }
  0x39   :  { %874 = vmatpush3.msra.mxu0 %v1173_v61  ;;  %901 = vmatpush3.msra.mxu1 %v1066_v17 }
  0x3a   :  { %875 = vmatprep.subr.mxu0 %v995_v0  ;;  %902 = vmatprep.subr.mxu1 %v995_v0 }
  0x3b   :  { %876 = vmatpush3.msra.mxu0 %v1190_v8  ;;  %903 = vmatpush3.msra.mxu1 %v1085_v25 }
  0x3c   :  { %877 = vmatprep.subr.mxu0 %v995_v0  ;;  %904 = vmatprep.subr.mxu1 %v995_v0 }
  0x3d   :  { %878 = vmatpush3.msra.mxu0 %v1205_v31  ;;  %905 = vmatpush3.msra.mxu1 %v1092_v28 }
  0x3e   :  { %879 = vmatprep.subr.mxu0 %v995_v0  ;;  %906 = vmatprep.subr.mxu1 %v995_v0 }
  0x3f   :  { %880 = vmatpush3.msra.mxu0 %v1217_v38  ;;  %907 = vmatpush3.msra.mxu1 %v1112_v35 }
  0x40   :  { %881 = vmatprep.subr.mxu0 %v995_v0  ;;  %908 = vmatprep.subr.mxu1 %v995_v0 }
  0x41   :  { %882 = vmatpush3.msra.mxu0 %v1228_v49  ;;  %909 = vmatpush3.msra.mxu1 %v1133_v45 }
  0x42   :  { %883 = vmatprep.subr.mxu0 %v995_v0  ;;  %910 = vmatprep.subr.mxu1 %v995_v0 }
  0x43   :  { %884 = vmatpush3.msra.mxu0 %v1238_v54  ;;  %885 = vmatprep.mubr.msk.f32.mxu0 %vm996_vm0, %v995_v0 }
  0x44   :  { %911 = vmatpush3.msra.mxu1 %v1141_v48  ;;  %886 = vmatmul.mubr.f32.vlgmr.msra.gmra.mxu0 %v1202_v26 }
  0x45   :  { %912 = vmatprep.subr.mxu1 %v995_v0  ;;  %923 = vmatprep.subr.mxu0 %v995_v0 }
  0x46   :  { %913 = vmatpush3.msra.mxu1 %v1167_v59  ;;  %924 = vmatpush3.msra.mxu0 %v128_v22 }
  0x47   :  { %914 = vmatprep.subr.mxu1 %v995_v0  ;;  %925 = vmatprep.subr.mxu0 %v995_v0 }
  0x48   :  { %915 = vmatpush3.msra.mxu1 %v1179_v63  ;;  %926 = vmatpush3.msra.mxu0 %v135_v23 }
  0x49   :  { %916 = vmatprep.subr.mxu1 %v995_v0  ;;  %927 = vmatprep.subr.mxu0 %v995_v0 }
  0x4a   :  { %917 = vmatpush3.msra.mxu1 %v1197_v13  ;;  %928 = vmatpush3.msra.mxu0 %v142_v24 }
  0x4b   :  { %918 = vmatprep.subr.mxu1 %v995_v0  ;;  %929 = vmatprep.subr.mxu0 %v995_v0 }
  0x4c   :  { %919 = vmatpush3.msra.mxu1 %v1209_v32  ;;  %920 = vmatprep.mubr.msk.f32.mxu1 %vm996_vm0, %v995_v0 }
  0x4d   :  { %930 = vmatpush3.msra.mxu0 %v149_v27  ;;  %921 = vmatmul.mubr.f32.vlgmr.msra.gmra.mxu1 %v117_v42 }
  0x4e   :  { %931 = vmatprep.subr.mxu0 %v995_v0  ;;  %958 = vmatprep.subr.mxu1 %v995_v0 }
  0x4f   :  { %932 = vmatpush3.msra.mxu0 %v156_v29  ;;  %959 = vmatpush3.msra.mxu1 %v1028_v4 }
  0x50   :  { %933 = vmatprep.subr.mxu0 %v995_v0  ;;  %960 = vmatprep.subr.mxu1 %v995_v0 }
  0x51   :  { %934 = vmatpush3.msra.mxu0 %v163_v40  ;;  %961 = vmatpush3.msra.mxu1 %v1030_v5 }
  0x52   :  { %935 = vmatprep.subr.mxu0 %v995_v0  ;;  %962 = vmatprep.subr.mxu1 %v995_v0 }
  0x53   :  { %936 = vmatpush3.msra.mxu0 %v170_v46  ;;  %963 = vmatpush3.msra.mxu1 %v1032_v6 }
  0x54   :  { %937 = vmatprep.subr.mxu0 %v995_v0  ;;  %964 = vmatprep.subr.mxu1 %v995_v0 }
  0x55   :  { %938 = vmatpush3.msra.mxu0 %v177_v53  ;;  %965 = vmatpush3.msra.mxu1 %v1047_v10 }
  0x56   :  { %939 = vmatprep.subr.mxu0 %v995_v0  ;;  %966 = vmatprep.subr.mxu1 %v995_v0 }
  0x57   :  { %940 = vmatpush3.msra.mxu0 %v184_v57  ;;  %967 = vmatpush3.msra.mxu1 %v1049_v11 }
  0x58   :  { %941 = vmatprep.subr.mxu0 %v995_v0  ;;  %968 = vmatprep.subr.mxu1 %v995_v0 }
  0x59   :  { %942 = vmatpush3.msra.mxu0 %v191_v3  ;;  %969 = vmatpush3.msra.mxu1 %v1051_v12 }
  0x5a   :  { %943 = vmatprep.subr.mxu0 %v995_v0  ;;  %970 = vmatprep.subr.mxu1 %v995_v0 }
  0x5b   :  { %944 = vmatpush3.msra.mxu0 %v198_v19  ;;  %971 = vmatpush3.msra.mxu1 %v1066_v17  ;;  %v33_v17 = vstv %s1439_s2 }
  0x5c   :  { %945 = vmatprep.subr.mxu0 %v995_v0  ;;  %972 = vmatprep.subr.mxu1 %v995_v0 }
  0x5d   :  { %946 = vmatpush3.msra.mxu0 %v205_v37  ;;  %973 = vmatpush3.msra.mxu1 %v1085_v25 }
  0x5e   :  { %947 = vmatprep.subr.mxu0 %v995_v0  ;;  %974 = vmatprep.subr.mxu1 %v995_v0 }
  0x5f   :  { %948 = vmatpush3.msra.mxu0 %v212_v44  ;;  %975 = vmatpush3.msra.mxu1 %v1092_v28 }
  0x60   :  { %949 = vmatprep.subr.mxu0 %v995_v0  ;;  %976 = vmatprep.subr.mxu1 %v995_v0 }
  0x61   :  { %950 = vmatpush3.msra.mxu0 %v219_v52  ;;  %977 = vmatpush3.msra.mxu1 %v1112_v35 }
  0x62   :  { %951 = vmatprep.subr.mxu0 %v995_v0  ;;  %978 = vmatprep.subr.mxu1 %v995_v0 }
  0x63   :  { %952 = vmatpush3.msra.mxu0 %v226_v1  ;;  %979 = vmatpush3.msra.mxu1 %v1133_v45 }
  0x64   :  { %953 = vmatprep.subr.mxu0 %v995_v0  ;;  %980 = vmatprep.subr.mxu1 %v995_v0 }
  0x65   :  { %954 = vmatpush3.msra.mxu0 %v233_v9  ;;  %955 = vmatprep.mubr.msk.f32.mxu0 %vm996_vm0, %v995_v0 }
  0x66   :  { %981 = vmatpush3.msra.mxu1 %v1141_v48  ;;  %956 = vmatmul.mubr.f32.vlgmr.msra.gmra.mxu0 %v1175_v62 }
  0x67   :  { %982 = vmatprep.subr.mxu1 %v995_v0  ;;  %990 = vmatprep.mubr.msk.f32.mxu1 %vm996_vm0, %v995_v0 }
  0x68   :  { %983 = vmatpush3.msra.mxu1 %v1167_v59 }
  0x69   :  { %984 = vmatprep.subr.mxu1 %v995_v0 }
  0x6a   :  { %985 = vmatpush3.msra.mxu1 %v1179_v63 }
  0x6b   :  { %986 = vmatprep.subr.mxu1 %v995_v0 }
  0x6c   :  { %987 = vmatpush3.msra.mxu1 %v1197_v13 }
  0x6d   :  { %988 = vmatprep.subr.mxu1 %v995_v0 }
  0x6e   :  { %989 = vmatpush3.msra.mxu1 %v1209_v32 }
  0x6f   :  { %991 = vmatmul.mubr.f32.vlgmr.msra.gmra.mxu1 %v1175_v62 }
  0xe4   :  { %v121_v4 = vpop.f32.mrf.mxu0 }
  0xe5   :  { %v122_v18 = vadd.f32 %v121_v4, %v33_v17 }
  0xe6   :  { %v817_v5 = vpop.f32.mrf.mxu0 }
  0xeb   :  { %v272_v6 = vpop.f32.mrf.mxu1 }
  0xec   :  { %v273_v21 = vadd.f32 %v272_v6, %v122_v18 }
  0xed   :  { %v852_v10 = vpop.f32.mrf.mxu1 }
 0x104   :  { %v376_v11 = vpop.f32.mrf.mxu0 }
 0x105   :  { %v377_v22 = vadd.f32 %v376_v11, %v273_v21 }
 0x106   :  { %v887_v12 = vpop.f32.mrf.mxu0 }
 0x10d   :  { %v465_v15 = vpop.f32.mrf.mxu1 }
 0x10e   :  { %v466_v23 = vadd.f32 %v465_v15, %v377_v22 }
 0x10f   :  { %v922_v16 = vpop.f32.mrf.mxu1 }
 0x126   :  { %v584_v20 = vpop.f32.mrf.mxu0 }
 0x127   :  { %v585_v24 = vadd.f32 %v584_v20, %v466_v23 }
 0x128   :  { %v957_v0 = vpop.f32.mrf.mxu0 }
 0x12f   :  { %v671_v25 = vpop.f32.mrf.mxu1 }
 0x130   :  { %v672_v27 = vadd.f32 %v671_v25, %v585_v24 }
 0x131   :  { %v992_v28 = vpop.f32.mrf.mxu1 }
 0x132   :  { %676 = vst.msk [vmem:[%s1440_s3] sm:$0xff] %vm675_vm1, %v672_v27 }

</bundles_post_ra>
